<compile_context>
chip_gen: v5e
topology: v5e:2x2
jax: 0.10.0
libtpu: 0.0.40
codegen_flags: <defaults>
</compile_context>

<pallas_src>
import jax
import jax.numpy as jnp
from jax.experimental import pallas as pl
from jax.experimental.pallas import tpu as pltpu

EPS = 1e-5
_VMEM_LIMIT = 40 * 1024 * 1024        # v7x-safe (64 MiB physical); fine on v5e/v6e
_BLOCK_BYTES_CAP = 4 * 1024 * 1024    # target x-block size for the streaming path
_FUSED_BYTES_CAP = 24 * 1024 * 1024   # whole-x-resident threshold for the fused path


def _cdiv(a, b):
    return (a + b - 1) // b


def _round_up(x, m):
    return _cdiv(x, m) * m


def _select_tiles(rows, hw, itemsize, block_bytes_cap):
    """Pick (rows_blk, hw_blk): (8/16,128)-aligned, hw contiguous when possible,
    block <= block_bytes_cap (in x's dtype), >=2 row tiles when rows allows."""
    sub_mult = max(8, 32 // itemsize)     # 8 f32 / 16 bf16 / 32 int8
    lane_mult = 128
    hw_full = _round_up(hw, lane_mult)

    # Prefer a full (contiguous) row of H*W per block when even the minimum row
    # tile fits the byte budget; otherwise cap hw_blk and keep rows minimal.
    if sub_mult * hw_full * itemsize <= block_bytes_cap:
        hw_blk = hw_full
    else:
        hw_blk = max(lane_mult,
                     (block_bytes_cap // (sub_mult * itemsize)) // lane_mult * lane_mult)

    rows_fit = max(sub_mult,
                   (block_bytes_cap // (hw_blk * itemsize)) // sub_mult * sub_mult)
    rows_blk = min(rows_fit, _round_up(rows, sub_mult))

    # Megacore (v7x): aim for >= 2 row tiles so both TensorCores get work.
    if rows > sub_mult and _cdiv(rows, rows_blk) < 2:
        rows_blk = _round_up(_cdiv(rows, 2), sub_mult)

    return rows_blk, hw_blk


# -------------------- Fused single-pass kernel (small inputs) --------------------

def _make_fused_kernel(count):
    inv_count = 1.0 / float(count)

    def kernel(x_ref, ab_ref, o_ref):
        # x_ref: (N, C, HW); ab_ref: (N, C, 2) packed [alpha, beta].
        x = x_ref[...].astype(jnp.float32)                  # (N, C, HW)
        s = jnp.sum(x, axis=2, keepdims=True)               # (N, C, 1)
        ss = jnp.sum(x * x, axis=2, keepdims=True)          # (N, C, 1)
        sum_c = jnp.sum(s, axis=0, keepdims=True)           # (1, C, 1)
        sumsq_c = jnp.sum(ss, axis=0, keepdims=True)        # (1, C, 1)
        mean = sum_c * inv_count
        var = jnp.maximum(sumsq_c * inv_count - mean * mean, 0.0)
        inv_std = jax.lax.rsqrt(var + EPS)                  # (1, C, 1)

        ab = ab_ref[...].astype(jnp.float32)                # (N, C, 2)
        alpha = ab[:, :, 0:1]                               # (N, C, 1)
        beta = ab[:, :, 1:2]                                # (N, C, 1)
        scale = inv_std * (1.0 + beta)                      # (N, C, 1)
        shift = alpha - mean * scale                        # (N, C, 1)
        o_ref[...] = (x * scale + shift).astype(o_ref.dtype)

    return kernel


# ---------------- Pass 1 (streaming): per-row packed sum / sum-of-squares ---------

def _make_stats_kernel(rows, hw, rows_blk, hw_blk):
    ragged_rows = (rows % rows_blk) != 0
    ragged_hw = (hw % hw_blk) != 0

    def kernel(x_ref, acc_ref):
        # Zero the resident accumulator at the start of each row-tile's HW sweep.
        @pl.when(pl.program_id(1) == 0)
        def _init():
            acc_ref[...] = jnp.zeros_like(acc_ref)

        x = x_ref[...].astype(jnp.float32)                  # (rows_blk, hw_blk)

        # OOB input blocks contain garbage, not zeros -> mask the ragged tails.
        if ragged_rows or ragged_hw:
            mask = None
            if ragged_rows:
                r0 = pl.program_id(0) * rows_blk
                rid = jax.lax.broadcasted_iota(jnp.int32, (rows_blk, hw_blk), 0)
                mask = (rid + r0) < rows
            if ragged_hw:
                c0 = pl.program_id(1) * hw_blk
                cid = jax.lax.broadcasted_iota(jnp.int32, (rows_blk, hw_blk), 1)
                m2 = (cid + c0) < hw
                mask = m2 if mask is None else jnp.logical_and(mask, m2)
            x = jnp.where(mask, x, 0.0)

        acc_ref[:, 0:1] += jnp.sum(x, axis=1, keepdims=True)      # sum
        acc_ref[:, 1:2] += jnp.sum(x * x, axis=1, keepdims=True)  # sum of squares

    return kernel


# ---------------- Pass 2 (streaming): out = x * scale + shift ---------------------

def _apply_kernel(ss_ref, x_ref, o_ref):
    scale = ss_ref[:, 0:1]                                  # (rows_blk, 1) f32
    shift = ss_ref[:, 1:2]
    if o_ref.dtype == jnp.bfloat16:
        # bf16 fast path (v6e/v7x): halve vreg pressure, no full-tile f32 casts.
        o_ref[...] = (x_ref[...] * scale.astype(jnp.bfloat16)
                      + shift.astype(jnp.bfloat16))
    else:
        x = x_ref[...].astype(jnp.float32)
        o_ref[...] = (x * scale + shift).astype(o_ref.dtype)
    # OOB sublanes/lanes of the last ragged tile are dropped on writeback.


def film2d_forward(x_nchw, y, emb_table, *,
                   block_bytes_cap=_BLOCK_BYTES_CAP,
                   fused_vmem_cap_bytes=_FUSED_BYTES_CAP):
    """FiLM2d forward: alpha + BN(x) * (1 + beta), training-mode BatchNorm2d."""
    N, C, H, W = x_nchw.shape
    rows, hw = N * C, H * W
    count = N * H * W
    dtype = x_nchw.dtype
    itemsize = jnp.dtype(dtype).itemsize

    # Embedding lookup + chunk(2, dim=1): cheap glue in plain JAX.
    emb_y = emb_table[y].astype(jnp.float32)                # (N, 2*C)
    alpha, beta = emb_y[:, :C], emb_y[:, C:]                # (N, C) each

    sub_mult = max(8, 32 // itemsize)

    # ---------------- Fused single-pass path (whole x resident in VMEM) ----------
    padded_elems = N * _round_up(C, sub_mult) * _round_up(hw, 128)
    fused_bytes = padded_elems * (2 * itemsize + 8)         # x in + out + ~2 f32 temps
    if fused_bytes <= fused_vmem_cap_bytes:
        x3 = x_nchw.reshape(N, C, hw)
        ab = jnp.stack([alpha, beta], axis=-1)              # (N, C, 2) f32
        out3 = pl.pallas_call(
            _make_fused_kernel(count),
            out_shape=jax.ShapeDtypeStruct((N, C, hw), dtype),
            grid=(1,),
            in_specs=[pl.BlockSpec((N, C, hw), lambda i: (0, 0, 0)),
                      pl.BlockSpec((N, C, 2), lambda i: (0, 0, 0))],
            out_specs=pl.BlockSpec((N, C, hw), lambda i: (0, 0, 0)),
            compiler_params=pltpu.CompilerParams(
                dimension_semantics=("arbitrary",),
                vmem_limit_bytes=_VMEM_LIMIT,
            ),
        )(x3, ab)
        return out3.reshape(N, C, H, W)

    # ---------------- Two-pass streaming path -----------------------------------
    rows_blk, hw_blk = _select_tiles(rows, hw, itemsize, block_bytes_cap)
    grid = (pl.cdiv(rows, rows_blk), pl.cdiv(hw, hw_blk))
    x2 = x_nchw.reshape(rows, hw)                           # free metadata reshape

    # Pass 1: packed per-row [sum, sumsq] accumulator, exact (rows, 2) output.
    row_acc = pl.pallas_call(
        _make_stats_kernel(rows, hw, rows_blk, hw_blk),
        out_shape=jax.ShapeDtypeStruct((rows, 2), jnp.float32),
        grid=grid,
        in_specs=[pl.BlockSpec((rows_blk, hw_blk), lambda r, t: (r, t))],
        out_specs=pl.BlockSpec((rows_blk, 2), lambda r, t: (r, 0)),
        compiler_params=pltpu.CompilerParams(
            dimension_semantics=("parallel", "arbitrary"),
            vmem_limit_bytes=_VMEM_LIMIT,
        ),
    )(x2)

    # Tiny glue (O(N*C)): per-channel stats + FiLM folded into scale/shift.
    sum_c = row_acc[:, 0].reshape(N, C).sum(axis=0)         # (C,)
    sumsq_c = row_acc[:, 1].reshape(N, C).sum(axis=0)       # (C,)
    mean = sum_c / count
    var = jnp.maximum(sumsq_c / count - mean * mean, 0.0)   # biased var
    inv_std = jax.lax.rsqrt(var + EPS)
    scale = inv_std[None, :] * (1.0 + beta)                 # (N, C)
    shift = alpha - mean[None, :] * scale                   # (N, C)
    ss = jnp.concatenate([scale.reshape(rows, 1), shift.reshape(rows, 1)],
                         axis=1).astype(jnp.float32)        # (rows, 2)

    # Pass 2: out = x * scale + shift, fully parallel, exact-shape output.
    out2 = pl.pallas_call(
        _apply_kernel,
        out_shape=jax.ShapeDtypeStruct((rows, hw), dtype),
        grid=grid,
        in_specs=[
            pl.BlockSpec((rows_blk, 2), lambda r, t: (r, 0)),
            pl.BlockSpec((rows_blk, hw_blk), lambda r, t: (r, t)),
        ],
        out_specs=pl.BlockSpec((rows_blk, hw_blk), lambda r, t: (r, t)),
        compiler_params=pltpu.CompilerParams(
            dimension_semantics=("parallel", "parallel"),
            vmem_limit_bytes=_VMEM_LIMIT,
        ),
    )(ss, x2)

    return out2.reshape(N, C, H, W)


def film2d_reference(x_nchw, y, emb_table):
    """Pure-JAX reference mirroring the PyTorch module (training-mode BN)."""
    N, C, H, W = x_nchw.shape
    mean = jnp.mean(x_nchw, axis=(0, 2, 3), keepdims=True)
    var = jnp.mean((x_nchw - mean) ** 2, axis=(0, 2, 3), keepdims=True)
    out = (x_nchw - mean) / jnp.sqrt(var + EPS)
    emb_y = emb_table[y]
    alpha = emb_y[:, :C][:, :, None, None]
    beta = emb_y[:, C:][:, :, None, None]
    return alpha + out * (1 + beta)


if __name__ == "__main__":
    key = jax.random.PRNGKey(0)
    k1, k2, k3, k4, k5, k6 = jax.random.split(key, 6)

    # Case 1: small aligned shapes (fused path by default; streaming path forced).
    N, C, H, W = 2, 4, 16, 16
    n_classes = 10
    x = jax.random.normal(k1, (N, C, H, W), dtype=jnp.float32)
    y = jax.random.randint(k2, (N,), 0, n_classes, dtype=jnp.int32)
    emb_table = jax.random.normal(k3, (n_classes, 2 * C), dtype=jnp.float32)

    out_fused = jax.block_until_ready(film2d_forward(x, y, emb_table))
    out_stream = jax.block_until_ready(
        film2d_forward(x, y, emb_table, fused_vmem_cap_bytes=0))
    ref = film2d_reference(x, y, emb_table)
    assert out_fused.shape == (N, C, H, W)
    assert jnp.allclose(out_fused, ref, atol=1e-4, rtol=1e-4), "fused mismatch"
    assert jnp.allclose(out_stream, ref, atol=1e-4, rtol=1e-4), "streaming mismatch"

    # Case 2: ragged rows (N*C=6) and ragged H*W (100) to exercise the masked
    # tails of the streaming path and the unaligned full-array fused path.
    N2, C2, H2, W2 = 2, 3, 10, 10
    n_classes2 = 7
    x_r = jax.random.normal(k4, (N2, C2, H2, W2), dtype=jnp.float32)
    y_r = jax.random.randint(k5, (N2,), 0, n_classes2, dtype=jnp.int32)
    emb_r = jax.random.normal(k6, (n_classes2, 2 * C2), dtype=jnp.float32)

    out_r_fused = jax.block_until_ready(film2d_forward(x_r, y_r, emb_r))
    out_r_stream = jax.block_until_ready(
        film2d_forward(x_r, y_r, emb_r, fused_vmem_cap_bytes=0))
    ref_r = film2d_reference(x_r, y_r, emb_r)
    assert jnp.allclose(out_r_fused, ref_r, atol=1e-4, rtol=1e-4), "ragged fused mismatch"
    assert jnp.allclose(out_r_stream, ref_r, atol=1e-4, rtol=1e-4), "ragged streaming mismatch"

    print("KERNEL_OK")
</pallas_src>

<mosaic_0001>
module attributes {stable_mosaic.version = 11 : i64} {
  func.func @kernel(%arg0: i32, %arg1: memref<2x4x256xf32, #tpu.memory_space<vmem>>, %arg2: memref<2x4x2xf32, #tpu.memory_space<vmem>>, %arg3: memref<2x4x256xf32, #tpu.memory_space<vmem>>) attributes {dimension_semantics = [#tpu.dimension_semantics<arbitrary>], iteration_bounds = array<i64: 1>, scalar_prefetch = 0 : i64, scratch_operands = 0 : i64, tpu.core_type = #tpu.core_type<tc>, window_params = [{pipeline_mode = #tpu.pipeline_mode<synchronous>, transform_indices = @transform_0, window_bounds = array<i64: 2, 4, 256>}, {pipeline_mode = #tpu.pipeline_mode<synchronous>, transform_indices = @transform_1, window_bounds = array<i64: 2, 4, 2>}, {pipeline_mode = #tpu.pipeline_mode<synchronous>, transform_indices = @transform_2, window_bounds = array<i64: 2, 4, 256>}]} {
    %c0 = arith.constant 0 : index
    %c0_0 = arith.constant 0 : index
    %c0_1 = arith.constant 0 : index
    %0 = vector.load %arg1[%c0, %c0_0, %c0_1] : memref<2x4x256xf32, #tpu.memory_space<vmem>>, vector<2x4x256xf32>
    %cst = arith.constant dense<0.000000e+00> : vector<2x4xf32>
    %1 = vector.multi_reduction <add>, %0, %cst [2] : vector<2x4x256xf32> to vector<2x4xf32>
    %2 = vector.shape_cast %1 : vector<2x4xf32> to vector<2x4x1xf32>
    %3 = arith.mulf %0, %0 : vector<2x4x256xf32>
    %cst_2 = arith.constant dense<0.000000e+00> : vector<2x4xf32>
    %4 = vector.multi_reduction <add>, %3, %cst_2 [2] : vector<2x4x256xf32> to vector<2x4xf32>
    %5 = vector.shape_cast %4 : vector<2x4xf32> to vector<2x4x1xf32>
    %cst_3 = arith.constant dense<0.000000e+00> : vector<4x1xf32>
    %6 = vector.multi_reduction <add>, %2, %cst_3 [0] : vector<2x4x1xf32> to vector<4x1xf32>
    %7 = vector.shape_cast %6 : vector<4x1xf32> to vector<1x4x1xf32>
    %cst_4 = arith.constant dense<0.000000e+00> : vector<4x1xf32>
    %8 = vector.multi_reduction <add>, %5, %cst_4 [0] : vector<2x4x1xf32> to vector<4x1xf32>
    %9 = vector.shape_cast %8 : vector<4x1xf32> to vector<1x4x1xf32>
    %cst_5 = arith.constant 0.001953125 : f32
    %10 = vector.broadcast %cst_5 : f32 to vector<1x4x1xf32>
    %11 = arith.mulf %7, %10 : vector<1x4x1xf32>
    %cst_6 = arith.constant 0.001953125 : f32
    %12 = vector.broadcast %cst_6 : f32 to vector<1x4x1xf32>
    %13 = arith.mulf %9, %12 : vector<1x4x1xf32>
    %14 = arith.mulf %11, %11 : vector<1x4x1xf32>
    %15 = arith.subf %13, %14 : vector<1x4x1xf32>
    %cst_7 = arith.constant 0.000000e+00 : f32
    %16 = vector.broadcast %cst_7 : f32 to vector<1x4x1xf32>
    %17 = arith.maximumf %15, %16 : vector<1x4x1xf32>
    %cst_8 = arith.constant 9.99999974E-6 : f32
    %18 = vector.broadcast %cst_8 : f32 to vector<1x4x1xf32>
    %19 = arith.addf %17, %18 : vector<1x4x1xf32>
    %20 = math.rsqrt %19 : vector<1x4x1xf32>
    %c0_9 = arith.constant 0 : index
    %c0_10 = arith.constant 0 : index
    %c0_11 = arith.constant 0 : index
    %21 = vector.load %arg2[%c0_9, %c0_10, %c0_11] : memref<2x4x2xf32, #tpu.memory_space<vmem>>, vector<2x4x2xf32>
    %22 = vector.extract_strided_slice %21 {offsets = [0, 0, 0], sizes = [2, 4, 1], strides = [1, 1, 1]} : vector<2x4x2xf32> to vector<2x4x1xf32>
    %23 = vector.extract_strided_slice %21 {offsets = [0, 0, 1], sizes = [2, 4, 1], strides = [1, 1, 1]} : vector<2x4x2xf32> to vector<2x4x1xf32>
    %cst_12 = arith.constant 1.000000e+00 : f32
    %24 = vector.broadcast %cst_12 : f32 to vector<2x4x1xf32>
    %25 = arith.addf %24, %23 : vector<2x4x1xf32>
    %26 = vector.broadcast %20 : vector<1x4x1xf32> to vector<2x4x1xf32>
    %27 = arith.mulf %26, %25 : vector<2x4x1xf32>
    %28 = vector.broadcast %11 : vector<1x4x1xf32> to vector<2x4x1xf32>
    %29 = arith.mulf %28, %27 : vector<2x4x1xf32>
    %30 = arith.subf %22, %29 : vector<2x4x1xf32>
    %31 = vector.broadcast %27 : vector<2x4x1xf32> to vector<2x4x256xf32>
    %32 = arith.mulf %0, %31 : vector<2x4x256xf32>
    %33 = vector.broadcast %30 : vector<2x4x1xf32> to vector<2x4x256xf32>
    %34 = arith.addf %32, %33 : vector<2x4x256xf32>
    %c0_13 = arith.constant 0 : index
    %c0_14 = arith.constant 0 : index
    %c0_15 = arith.constant 0 : index
    %35 = vector.load %arg3[%c0_13, %c0_14, %c0_15] : memref<2x4x256xf32, #tpu.memory_space<vmem>>, vector<2x4x256xf32>
    tpu.vector_store %arg3[%c0_13, %c0_14, %c0_15], %34 {strides = array<i32>} : memref<2x4x256xf32, #tpu.memory_space<vmem>>, vector<2x4x256xf32>,
    return
  }
  func.func @transform_0(%arg0: i32) -> (i32, i32, i32) {
    %c0_i32 = arith.constant 0 : i32
    %c0_i32_0 = arith.constant 0 : i32
    %c0_i32_1 = arith.constant 0 : i32
    %c0_i32_2 = arith.constant 0 : i32
    return %c0_i32, %c0_i32_0, %c0_i32_1 : i32, i32, i32
  }
  func.func @transform_1(%arg0: i32) -> (i32, i32, i32) {
    %c0_i32 = arith.constant 0 : i32
    %c0_i32_0 = arith.constant 0 : i32
    %c0_i32_1 = arith.constant 0 : i32
    %c0_i32_2 = arith.constant 0 : i32
    return %c0_i32, %c0_i32_0, %c0_i32_1 : i32, i32, i32
  }
  func.func @transform_2(%arg0: i32) -> (i32, i32, i32) {
    %c0_i32 = arith.constant 0 : i32
    %c0_i32_0 = arith.constant 0 : i32
    %c0_i32_1 = arith.constant 0 : i32
    %c0_i32_2 = arith.constant 0 : i32
    return %c0_i32, %c0_i32_0, %c0_i32_1 : i32, i32, i32
  }
}

</mosaic_0001>

<bundles_post_ra>
// kernel: tpu_custom_call.1
= control target key start
LH: loop header
LB: loop body
LE: loop exit
PB: predicated region body
PF: predicated region fallthrough
CT: control target
= control target key end

     0   :  { %7 = vsyncpa [#allocation3], 0  ;;  %s311_s0 = inlined_call_operand.hbm [shape: f32[2,4,256], index: 0, kind: input, shape index: {}]   ;;  %s312_s1 = inlined_call_operand.vmem [shape: f32[2,4,2], index: 1, kind: input, shape index: {}]   ;;  %s313_s2 = inlined_call_operand.hbm [shape: f32[2,4,256], index: 2, kind: output, shape index: {}]  }
   0x1   :  { %8 = vsyncpa [#allocation4], 0  ;;  %s13_s11 = sshll.u32 %s311_s0, 4  ;;  %s246_s12 = smov [#allocation2]   ;;  %s14_s11 = int_to_ptr.hbm [resolvable:$true] %s13_s11 }
   0x2   :  { %s15_s13 = sshll.u32 %s246_s12, 4  ;;  %s247_s14 = smov 128   ;;  %s16_s13 = int_to_ptr.vmem [resolvable:$true] %s15_s13 }
   0x3   :  { %s248_s15 = smov 8  }
   0x4   :  { %21 = dma.hbm_to_vmem [thread:$0]  %s14_s11, 256, %s16_s13, [#allocation3], %s247_s14, %s247_s14, %s248_s15  }
   0x5   :  { %242 = dma.done.wait [#allocation3], 256  }
   0x6   :  { %243 = vsyncadd [#allocation3], 4294967040  ;;  %v275_v0 = vld [vmem:[#allocation2] sm:$0xff]  ;;  %v277_v1 = vld [vmem:[#allocation2 + $0x8] sm:$0xff]  ;;  %vm43_vm0 = vcmask 1043456   ;;  %v249_v25 = vmov 1  }
   0x7   :  { %32 = vst [vmem:[#allocation1] ss:$2 sm:$0xff] %v275_v0  ;;  %v54_v2 = vmul.f32 %v275_v0, %v275_v0  ;;  %v55_v3 = vmul.f32 %v277_v1, %v277_v1  ;;  %189 = vset.pattern.permute.xlu1 %v249_v25  ;;  %188 = vset.pattern.permute.xlu0 %v249_v25  ;;  %v102_v45 = vld [vmem:[%s312_s1 + $0x4] sm:$0xf]  ;;  %v101_v46 = vld [vmem:[%s312_s1] sm:$0xf] }
   0x8   :  { %36 = vst [vmem:[#allocation1 + $0x10] ss:$2 sm:$0xff] %v277_v1  ;;  %v104_v48 = vadd.f32 1.0, %v102_v45  ;;  %v103_v49 = vadd.f32 1.0, %v101_v46  ;;  %s250_s19 = smov 127   ;;  %v251_v56 = vmov 0  }
   0x9   :  { %190 = vset.pattern.permute.xlu2 %v251_v56  ;;  %v252_v61 = vmov 839922192   ;;  %s253_s1 = smov [#allocation5]   ;;  %s167_s23 = sshll.u32 %s313_s2, 4  ;;  %s168_s23 = int_to_ptr.hbm [resolvable:$true] %s167_s23 }
   0xa   :  { %v128_v62 = vunpack.c.l.s4 %v252_v61  ;;  %s165_s20 = sshll.u32 %s253_s1, 4  ;;  %s166_s20 = int_to_ptr.vmem [resolvable:$true] %s165_s20 }
   0xc   :  { %v129_v63 = vunpack.c.0.s8 %v128_v62 }
   0xe   :  { %v33_v4 = vld.sshfl [vmem:[#allocation1] sm:$0xff pattern:$0x75316420]  ;;  %v34_v5 = vld.sshfl [vmem:[#allocation1 + $0x8] sm:$0xff pattern:$0x75316420] }
   0xf   :  { %v44_v6 = vsel %vm43_vm0, %v33_v4, 0.0  ;;  %v45_v7 = vsel %vm43_vm0, %v34_v5, 0.0  ;;  %58 = vst [vmem:[#allocation1] ss:$2 sm:$0xff] %v54_v2 }
  0x10   :  { %v46_v8 = vadd.f32 %v45_v7, %v44_v6  ;;  %v37_v9 = vld.sshfl [vmem:[#allocation1 + $0x10] sm:$0xff pattern:$0x75316420]  ;;  %v38_v10 = vld.sshfl [vmem:[#allocation1 + $0x18] sm:$0xff pattern:$0x75316420] }
  0x11   :  { %62 = vst [vmem:[#allocation1 + $0x10] ss:$2 sm:$0xff] %v55_v3  ;;  %v49_v11 = vsel %vm43_vm0, %v37_v9, 0.0  ;;  %v50_v12 = vsel %vm43_vm0, %v38_v10, 0.0 }
  0x12   :  { %47 = vadd.xlane.f32.xlu0 %v46_v8  ;;  %v51_v15 = vadd.f32 %v50_v12, %v49_v11 }
  0x16   :  { %v59_v13 = vld.sshfl [vmem:[#allocation1] sm:$0xff pattern:$0x75316420]  ;;  %v60_v14 = vld.sshfl [vmem:[#allocation1 + $0x8] sm:$0xff pattern:$0x75316420] }
  0x17   :  { %v69_v16 = vsel %vm43_vm0, %v59_v13, 0.0  ;;  %v70_v17 = vsel %vm43_vm0, %v60_v14, 0.0 }
  0x18   :  { %v71_v18 = vadd.f32 %v70_v17, %v69_v16  ;;  %v63_v19 = vld.sshfl [vmem:[#allocation1 + $0x10] sm:$0xff pattern:$0x75316420]  ;;  %v64_v20 = vld.sshfl [vmem:[#allocation1 + $0x18] sm:$0xff pattern:$0x75316420] }
  0x19   :  { %v74_v21 = vsel %vm43_vm0, %v63_v19, 0.0  ;;  %v75_v22 = vsel %vm43_vm0, %v64_v20, 0.0 }
  0x1a   :  { %72 = vadd.xlane.f32.xlu1 %v71_v18  ;;  %52 = vadd.xlane.f32.xlu0 %v51_v15  ;;  %v76_v23 = vadd.f32 %v75_v22, %v74_v21 }
  0x22   :  { %77 = vadd.xlane.f32.xlu1 %v76_v23 }
  0x85   :  { %v48_v24 = vpop.xlane.xlu0 %47 }
  0x86   :  { %v79_v29 = vsel %vm43_vm0, %v48_v24, 0.0 }
  0x8d   :  { %v73_v26 = vpop.xlane.xlu1 %72  ;;  %v53_v27 = vpop.xlane.xlu0 %52 }
  0x8e   :  { %v80_v28 = vsel %vm43_vm0, %v53_v27, 0.0  ;;  %v82_v33 = vsel %vm43_vm0, %v73_v26, 0.0 }
  0x8f   :  { %v81_v30 = vadd.f32 %v80_v28, %v79_v29 }
  0x91   :  { %v85_v31 = vmul.f32 0.001953125, %v81_v30 }
  0x93   :  { %v87_v37 = vmul.f32 %v85_v31, %v85_v31 }
  0x95   :  { %v78_v32 = vpop.xlane.xlu1 %77 }
  0x96   :  { %v83_v34 = vsel %vm43_vm0, %v78_v32, 0.0 }
  0x97   :  { %v84_v35 = vadd.f32 %v83_v34, %v82_v33 }
  0x99   :  { %v86_v36 = vmul.f32 0.001953125, %v84_v35 }
  0x9b   :  { %v88_v38 = vsub.f32 %v86_v36, %v87_v37 }
  0x9d   :  { %v89_v39 = vmax.f32 %v88_v38, 0.0 }
  0x9f   :  { %v90_v40 = vadd.f32 1e-05, %v89_v39 }
  0xa1   :  { %192 = vrsqrt.f32 %v90_v40  ;;  %vm97_vm2 = vweird.f32 %v90_v40 }
  0xa7   :  { %v193_v41 = vpop.eup %192 }
  0xa8   :  { %v92_v42 = vmul.f32 %v193_v41, %v90_v40  ;;  %vm98_vm1 = vweird.f32 %v193_v41 }
  0xa9   :  { %vm99_vm3 = vmor %vm97_vm2, %vm98_vm1 }
  0xaa   :  { %v93_v43 = vmul.f32 %v193_v41, %v92_v42 }
  0xac   :  { %v94_v44 = vmul.f32 0.5, %v93_v43 }
  0xae   :  { %v95_v47 = vsub.f32 1.5, %v94_v44 }
  0xb0   :  { %v96_v50 = vmul.f32 %v193_v41, %v95_v47 }
  0xb2   :  { %v100_v51 = vsel %vm99_vm3, %v193_v41, %v96_v50 }
  0xb3   :  { %v106_v52 = vmul.f32 %v104_v48, %v100_v51  ;;  %v105_v53 = vmul.f32 %v103_v49, %v100_v51 }
  0xb5   :  { %125 = vperm.xlu1 %189, %v106_v52   ;;  %121 = vperm.xlu0 %188, %v105_v53   ;;  %v107_v54 = vmul.f32 %v105_v53, %v85_v31  ;;  %v108_v55 = vmul.f32 %v106_v52, %v85_v31 }
  0xb7   :  { %111 = vrot.lane.b32.xlu2 %v107_v54, %s250_s19 }
  0xbd   :  { %191 = vset.pattern.permute.xlu0 %v251_v56 }
  0xbf   :  { %113 = vrot.lane.b32.xlu2 %v108_v55, %s250_s19 }
 0x111   :  { %v112_v57 = vpop.permute.xlu2 %111 }
 0x112   :  { %v117_v58 = vsub.f32 %v101_v46, %v112_v57 }
 0x114   :  { %141 = vperm.xlu2 %190, %v117_v58  }
 0x119   :  { %v114_v59 = vpop.permute.xlu2 %113 }
 0x11a   :  { %v118_v60 = vsub.f32 %v102_v45, %v114_v59 }
 0x11c   :  { %145 = vperm.xlu2 %190, %v118_v60  }
 0x127   :  { %v122_v2 = vpop.permute.xlu0 %121  ;;  %v126_v7 = vpop.permute.xlu1 %125 }
 0x128   :  { %v130_v3 = vperm.slane %v122_v2, %v129_v63  ;;  %v134_v9 = vperm.slane %v126_v7, %v129_v63 }
 0x12a   :  { %v137_v5 = vmul.f32 %v130_v3, %v275_v0  ;;  %v138_v11 = vmul.f32 %v134_v9, %v277_v1 }
 0x16e   :  { %v142_v4 = vpop.permute.xlu2 %141 }
 0x16f   :  { %v150_v6 = vperm.slane %v142_v4, %v129_v63 }
 0x171   :  { %v157_v8 = vadd.f32 %v150_v6, %v137_v5 }
 0x173   :  { %159 = vst [vmem:[#allocation5] sm:$0xff] %v157_v8 }
 0x176   :  { %v146_v10 = vpop.permute.xlu2 %145 }
 0x177   :  { %v154_v12 = vperm.slane %v146_v10, %v129_v63 }
 0x179   :  { %v158_v13 = vadd.f32 %v154_v12, %v138_v11 }
 0x17b   :  { %160 = vst [vmem:[#allocation5 + $0x8] sm:$0xff] %v158_v13 }
 0x17c   :  { %173 = dma.vmem_to_hbm [thread:$0]  %s166_s20, 256, %s168_s23, [#allocation4], %s247_s14, %s247_s14, %s248_s15  }
 0x17d   :  { %244 = dma.done.wait [#allocation4], 256  }
 0x17e   :  { %245 = vsyncadd [#allocation4], 4294967040 }
 0x17f   :  { %178 = vsyncpa [#allocation3], 1 }
 0x180   :  { %179 = vsyncpa [#allocation4], 1 }

</bundles_post_ra>
